<compile_context>
chip_gen: v7x
topology: tpu7x:2x2x1
jax: 0.10.0
libtpu: 0.0.40
codegen_flags: <defaults>
</compile_context>

<pallas_src>
import functools

import numpy as np
import jax
import jax.numpy as jnp
from jax import lax
from jax.experimental import pallas as pl
from jax.experimental.pallas import tpu as pltpu


def _round_up(v, m):
    return ((v + m - 1) // m) * m


def _lbn_kernel(x_ref, w_ref, s_ref, out_ref, *, M, Mp, T, Tp, eps):
    # One fused MXU pass: (8*Mp, 4N) @ (4N, TB) -> (8*Mp, TB).
    # Row-block layout (Mp rows each, 8-aligned): [pE rE pX rX pY rY pZ rZ].
    res = jnp.dot(w_ref[...], x_ref[...], preferred_element_type=jnp.float32)

    pE = res[0 * Mp:1 * Mp, :]
    rE = res[1 * Mp:2 * Mp, :]
    pX = res[2 * Mp:3 * Mp, :]
    rX = res[3 * Mp:4 * Mp, :]
    pY = res[4 * Mp:5 * Mp, :]
    rY = res[5 * Mp:6 * Mp, :]
    pZ = res[6 * Mp:7 * Mp, :]
    rZ = res[7 * Mp:8 * Mp, :]

    # enforce E >= |p| + eps (torch's in-place maximum on the E component)
    p_p = jnp.sqrt(pX * pX + pY * pY + pZ * pZ)
    pE = jnp.maximum(pE, p_p + eps)
    r2 = rX * rX + rY * rY + rZ * rZ
    inv_rp = lax.rsqrt(r2)                       # 1/|r|
    r_p = r2 * inv_rp                            # |r| without an extra sqrt
    rE = jnp.maximum(rE, r_p + eps)

    # Rest-frame boost parameters: n = r_vec/|r|, gamma = rE/r_m,
    # gamma*beta = |r|/r_m.  r_m^2 factored as (rE-|r|)(rE+|r|) (identical math
    # to torch's rE^2 - |r|^2, better f32 rounding); rsqrt avoids sqrt+divide.
    nx = rX * inv_rp
    ny = rY * inv_rp
    nz = rZ * inv_rp
    inv_rm = lax.rsqrt((rE - r_p) * (rE + r_p))
    gamma = rE * inv_rm
    gb = r_p * inv_rm                            # gamma * beta
    gm1 = gamma - 1.0

    # boosted_vecs = Lambda @ particle_vecs with Lambda expanded analytically:
    #   Lambda[0,0]=gamma, Lambda[0,j]=Lambda[j,0]=-gamma*beta*n_j,
    #   Lambda[i,j]=delta_ij + (gamma-1)*n_i*n_j
    ndp = nx * pX + ny * pY + nz * pZ
    bE = gamma * pE - gb * ndp
    bX = pX - gb * nx * pE + gm1 * nx * ndp
    bY = pY - gb * ny * pE + gm1 * ny * ndp
    bZ = pZ - gb * nz * pE + gm1 * nz * ndp

    pt2 = bX * bX + bY * bY
    p2 = pt2 + bZ * bZ
    inv_p = lax.rsqrt(p2)
    p = p2 * inv_p

    # clip_weights=False path: clamp boosted E before the 'e' / 'm' features.
    bE = jnp.maximum(bE, p + eps)

    pt = jnp.sqrt(pt2)
    xr = bZ * inv_p
    eta = 0.5 * jnp.log((1.0 + xr) * pl.reciprocal(1.0 - xr))   # atanh(pz/p)
    phi = jnp.arctan2(bY, bX)
    # NOTE: reproduces the torch source literally: sqrt(max(e^2, p^2) - p)
    # (the torch module subtracts p, not p^2).
    m_f = jnp.sqrt(jnp.maximum(bE * bE, p2) - p)

    # Direct 8-aligned, full-lane stores — no concatenate, no masked vst.
    out_ref[0 * Mp:1 * Mp, :] = bE
    out_ref[1 * Mp:2 * Mp, :] = pt
    out_ref[2 * Mp:3 * Mp, :] = eta
    out_ref[3 * Mp:4 * Mp, :] = phi
    out_ref[4 * Mp:5 * Mp, :] = m_f

    if T > 0:
        # Packed strict-lower-triangle pair_cos via a static selection matmul:
        # sel = S @ [uX; uY; uZ], cos_k = sum_c uC[i_k] * uC[j_k]
        #       == (b_i . b_j) / (p_i * p_j)   (torch ordering of pairs).
        # Padded (>= M) projection rows hold NaNs (zero weight rows -> rsqrt(0));
        # zero them so they cannot poison the matmul contraction.
        row = lax.broadcasted_iota(jnp.int32, bX.shape, 0)
        valid = row < M
        uX = jnp.where(valid, bX * inv_p, 0.0)
        uY = jnp.where(valid, bY * inv_p, 0.0)
        uZ = jnp.where(valid, bZ * inv_p, 0.0)
        u3 = jnp.concatenate([uX, uY, uZ], axis=0)              # (3*Mp, TB)
        sel = jnp.dot(s_ref[...], u3, preferred_element_type=jnp.float32)
        cos = (sel[0 * Tp:1 * Tp, :] * sel[3 * Tp:4 * Tp, :]
               + sel[1 * Tp:2 * Tp, :] * sel[4 * Tp:5 * Tp, :]
               + sel[2 * Tp:3 * Tp, :] * sel[5 * Tp:6 * Tp, :])
        out_ref[5 * Mp:5 * Mp + Tp, :] = cos


def _choose_tiling(B, N, Mp, Tp, batch_tile=None):
    """Lane (batch) tile, grid size and padded batch for the transposed layout."""
    try:
        info = pltpu.get_tpu_info()
        vmem_cap = int(getattr(info, "vmem_capacity_bytes", 64 << 20))
    except Exception:  # pragma: no cover - conservative fallback
        vmem_cap = 64 << 20
    f_rows = 5 * Mp + Tp
    # f32 bytes per batch column (lane) live in VMEM at once:
    #   double-buffered in/out tiles + fused matmul result + selection result
    #   + stacked unit vectors + ~26 live (Mp, .) temporaries.
    rows = 2 * (4 * N) + 2 * f_rows + 8 * Mp + 6 * Tp + 3 * Mp + 26 * Mp
    bytes_per_col = 4 * rows
    budget = max(vmem_cap // 2 - (4 << 20), 8 << 20)     # compiler headroom
    cap = max(128, (min(2048, budget // bytes_per_col) // 128) * 128)
    if batch_tile is not None:
        tb = max(128, _round_up(int(batch_tile), 128))
    else:
        # aim for >= 8 grid steps when the batch allows it, stay under VMEM cap
        tb = min(cap, max(128, _round_up(-(-B // 8), 128)))
    grid = max(2, -(-B // tb))    # never one grid step: keeps both TCs / pipeline busy
    return tb, grid, grid * tb, vmem_cap


def lbn_forward(e, px, py, pz, particle_w, restframe_w, *, eps=1e-5,
                batch_tile=None):
    """LBN with DEFAULT_FEATURES = [e, pt, eta, phi, m, pair_cos], clip_weights=False."""
    # TODO(synk): clip_weights=True and the non-default torch features
    # (px/py/pz/pair_dr) are not implemented here.
    f32 = jnp.float32
    B, N = e.shape
    M = particle_w.shape[1]
    T = M * (M - 1) // 2
    Mp = _round_up(max(M, 1), 8)                 # sublane-aligned block height
    Tp = _round_up(T, 8) if T > 0 else 0
    f_rows = 5 * Mp + Tp

    # Fused, sublane-padded, transposed weight: one (8Mp,4N)@(4N,TB) matmul
    # gives all eight {particle, restframe} x {E,X,Y,Z} projections at once,
    # each landing in an 8-aligned row block.
    wp = particle_w.astype(f32).T                # (M, N)
    wr = restframe_w.astype(f32).T
    w_big = jnp.zeros((8 * Mp, 4 * N), f32)
    for c in range(4):                           # component blocks: E, X, Y, Z
        w_big = w_big.at[(2 * c) * Mp:(2 * c) * Mp + M, c * N:(c + 1) * N].set(wp)
        w_big = w_big.at[(2 * c + 1) * Mp:(2 * c + 1) * Mp + M, c * N:(c + 1) * N].set(wr)

    # Static selection matrix for the strict lower triangle (row-major order,
    # identical to torch's boolean lower_tril mask gather), sublane-padded.
    if T > 0:
        ii, jj = np.tril_indices(M, -1)
        kk = np.arange(T)
        s_np = np.zeros((6 * Tp, 3 * Mp), np.float32)
        for c in range(3):
            s_np[c * Tp + kk, c * Mp + ii] = 1.0
            s_np[(3 + c) * Tp + kk, c * Mp + jj] = 1.0
    else:
        s_np = np.zeros((8, 3 * Mp), np.float32)   # unused dummy (M == 1)
    s_big = jnp.asarray(s_np)

    tb, grid, b_pad, vmem_cap = _choose_tiling(B, N, Mp, Tp, batch_tile)

    # Lane-dense stacked + transposed input (4N, B_pad) = [e; px; py; pz];
    # padded batch columns are zeros (their NaN results are sliced off below).
    x = jnp.concatenate([e, px, py, pz], axis=1).astype(f32).T
    if b_pad != B:
        x = jnp.pad(x, ((0, 0), (0, b_pad - B)))

    vmem_limit = int(min(vmem_cap * 3 // 4, 96 << 20))

    out = pl.pallas_call(
        functools.partial(_lbn_kernel, M=M, Mp=Mp, T=T, Tp=Tp, eps=eps),
        out_shape=jax.ShapeDtypeStruct((f_rows, b_pad), f32),
        grid=(grid,),
        in_specs=[
            pl.BlockSpec((4 * N, tb), lambda i: (0, i)),     # pipelined batch tile
            pl.BlockSpec(w_big.shape, lambda i: (0, 0)),     # resident fused weights
            pl.BlockSpec(s_big.shape, lambda i: (0, 0)),     # resident tril selector
        ],
        out_specs=pl.BlockSpec((f_rows, tb), lambda i: (0, i)),
        compiler_params=pltpu.CompilerParams(
            dimension_semantics=("parallel",),
            vmem_limit_bytes=vmem_limit,
        ),
    )(x, w_big, s_big)

    # Strip sublane / batch padding and return torch's (B, 5M + T) layout.
    blocks = [out[k * Mp:k * Mp + M, :B] for k in range(5)]
    if T > 0:
        blocks.append(out[5 * Mp:5 * Mp + T, :B])
    return jnp.concatenate(blocks, axis=0).T


if __name__ == "__main__":
    B, N, M = 16, 8, 6
    weight_init_scale = 1.0

    key = jax.random.PRNGKey(0)
    k1, k2, k3, k4, kw1, kw2 = jax.random.split(key, 6)

    # physical four-vector inputs (E computed from momenta + mass)
    px = 10.0 * jax.random.normal(k1, (B, N), jnp.float32)
    py = 10.0 * jax.random.normal(k2, (B, N), jnp.float32)
    pz = 10.0 * jax.random.normal(k3, (B, N), jnp.float32)
    mass = jax.random.uniform(k4, (B, N), jnp.float32, 0.1, 5.0)
    e = jnp.sqrt(px ** 2 + py ** 2 + pz ** 2 + mass ** 2)

    # deterministic parameters matching torch.rand(N, M) * weight_init_scale
    particle_w = jax.random.uniform(kw1, (N, M), jnp.float32) * weight_init_scale
    restframe_w = jax.random.uniform(kw2, (N, M), jnp.float32) * weight_init_scale

    lbn = jax.jit(lbn_forward)
    feats = lbn(e, px, py, pz, particle_w, restframe_w)
    jax.block_until_ready(feats)
    assert feats.shape == (B, 5 * M + M * (M - 1) // 2), feats.shape
    print("KERNEL_OK")
</pallas_src>

<mosaic_0001>
module attributes {stable_mosaic.version = 11 : i64} {
  func.func @_lbn_kernel(%arg0: i32, %arg1: memref<32x128xf32, #tpu.memory_space<vmem>>, %arg2: memref<64x32xf32, #tpu.memory_space<vmem>>, %arg3: memref<96x24xf32, #tpu.memory_space<vmem>>, %arg4: memref<56x128xf32, #tpu.memory_space<vmem>>) attributes {dimension_semantics = [#tpu.dimension_semantics<parallel>], iteration_bounds = array<i64: 2>, scalar_prefetch = 0 : i64, scratch_operands = 0 : i64, tpu.core_type = #tpu.core_type<tc>, window_params = [{transform_indices = @transform_0, window_bounds = array<i64: 32, 128>}, {pipeline_mode = #tpu.pipeline_mode<synchronous>, transform_indices = @transform_1, window_bounds = array<i64: 64, 32>}, {pipeline_mode = #tpu.pipeline_mode<synchronous>, transform_indices = @transform_2, window_bounds = array<i64: 96, 24>}, {transform_indices = @transform_3, window_bounds = array<i64: 56, 128>}]} {
    %c0 = arith.constant 0 : index
    %c0_0 = arith.constant 0 : index
    %0 = vector.load %arg2[%c0, %c0_0] : memref<64x32xf32, #tpu.memory_space<vmem>>, vector<64x32xf32>
    %c0_1 = arith.constant 0 : index
    %c0_2 = arith.constant 0 : index
    %1 = vector.load %arg1[%c0_1, %c0_2] : memref<32x128xf32, #tpu.memory_space<vmem>>, vector<32x128xf32>
    %cst = arith.constant dense<0.000000e+00> : vector<64x128xf32>
    %2 = tpu.matmul %0, %1, %cst {dimension_numbers = #tpu.dot_dimension_numbers<[1], [0], [0], [1], [0, 0, 1, 1], [], []>} : vector<64x32xf32>, vector<32x128xf32>, vector<64x128xf32> -> vector<64x128xf32>
    %3 = vector.extract_strided_slice %2 {offsets = [0, 0], sizes = [8, 128], strides = [1, 1]} : vector<64x128xf32> to vector<8x128xf32>
    %4 = vector.extract_strided_slice %2 {offsets = [8, 0], sizes = [8, 128], strides = [1, 1]} : vector<64x128xf32> to vector<8x128xf32>
    %5 = vector.extract_strided_slice %2 {offsets = [16, 0], sizes = [8, 128], strides = [1, 1]} : vector<64x128xf32> to vector<8x128xf32>
    %6 = vector.extract_strided_slice %2 {offsets = [24, 0], sizes = [8, 128], strides = [1, 1]} : vector<64x128xf32> to vector<8x128xf32>
    %7 = vector.extract_strided_slice %2 {offsets = [32, 0], sizes = [8, 128], strides = [1, 1]} : vector<64x128xf32> to vector<8x128xf32>
    %8 = vector.extract_strided_slice %2 {offsets = [40, 0], sizes = [8, 128], strides = [1, 1]} : vector<64x128xf32> to vector<8x128xf32>
    %9 = vector.extract_strided_slice %2 {offsets = [48, 0], sizes = [8, 128], strides = [1, 1]} : vector<64x128xf32> to vector<8x128xf32>
    %10 = vector.extract_strided_slice %2 {offsets = [56, 0], sizes = [8, 128], strides = [1, 1]} : vector<64x128xf32> to vector<8x128xf32>
    %11 = arith.mulf %5, %5 : vector<8x128xf32>
    %12 = arith.mulf %7, %7 : vector<8x128xf32>
    %13 = arith.addf %11, %12 : vector<8x128xf32>
    %14 = arith.mulf %9, %9 : vector<8x128xf32>
    %15 = arith.addf %13, %14 : vector<8x128xf32>
    %16 = math.sqrt %15 : vector<8x128xf32>
    %cst_3 = arith.constant 9.99999974E-6 : f32
    %17 = vector.broadcast %cst_3 : f32 to vector<8x128xf32>
    %18 = arith.addf %16, %17 : vector<8x128xf32>
    %19 = arith.maximumf %3, %18 : vector<8x128xf32>
    %20 = arith.mulf %6, %6 : vector<8x128xf32>
    %21 = arith.mulf %8, %8 : vector<8x128xf32>
    %22 = arith.addf %20, %21 : vector<8x128xf32>
    %23 = arith.mulf %10, %10 : vector<8x128xf32>
    %24 = arith.addf %22, %23 : vector<8x128xf32>
    %25 = math.rsqrt %24 : vector<8x128xf32>
    %26 = arith.mulf %24, %25 : vector<8x128xf32>
    %cst_4 = arith.constant 9.99999974E-6 : f32
    %27 = vector.broadcast %cst_4 : f32 to vector<8x128xf32>
    %28 = arith.addf %26, %27 : vector<8x128xf32>
    %29 = arith.maximumf %4, %28 : vector<8x128xf32>
    %30 = arith.mulf %6, %25 : vector<8x128xf32>
    %31 = arith.mulf %8, %25 : vector<8x128xf32>
    %32 = arith.mulf %10, %25 : vector<8x128xf32>
    %33 = arith.subf %29, %26 : vector<8x128xf32>
    %34 = arith.addf %29, %26 : vector<8x128xf32>
    %35 = arith.mulf %33, %34 : vector<8x128xf32>
    %36 = math.rsqrt %35 : vector<8x128xf32>
    %37 = arith.mulf %29, %36 : vector<8x128xf32>
    %38 = arith.mulf %26, %36 : vector<8x128xf32>
    %cst_5 = arith.constant 1.000000e+00 : f32
    %39 = vector.broadcast %cst_5 : f32 to vector<8x128xf32>
    %40 = arith.subf %37, %39 : vector<8x128xf32>
    %41 = arith.mulf %30, %5 : vector<8x128xf32>
    %42 = arith.mulf %31, %7 : vector<8x128xf32>
    %43 = arith.addf %41, %42 : vector<8x128xf32>
    %44 = arith.mulf %32, %9 : vector<8x128xf32>
    %45 = arith.addf %43, %44 : vector<8x128xf32>
    %46 = arith.mulf %37, %19 : vector<8x128xf32>
    %47 = arith.mulf %38, %45 : vector<8x128xf32>
    %48 = arith.subf %46, %47 : vector<8x128xf32>
    %49 = arith.mulf %38, %30 : vector<8x128xf32>
    %50 = arith.mulf %49, %19 : vector<8x128xf32>
    %51 = arith.subf %5, %50 : vector<8x128xf32>
    %52 = arith.mulf %40, %30 : vector<8x128xf32>
    %53 = arith.mulf %52, %45 : vector<8x128xf32>
    %54 = arith.addf %51, %53 : vector<8x128xf32>
    %55 = arith.mulf %38, %31 : vector<8x128xf32>
    %56 = arith.mulf %55, %19 : vector<8x128xf32>
    %57 = arith.subf %7, %56 : vector<8x128xf32>
    %58 = arith.mulf %40, %31 : vector<8x128xf32>
    %59 = arith.mulf %58, %45 : vector<8x128xf32>
    %60 = arith.addf %57, %59 : vector<8x128xf32>
    %61 = arith.mulf %38, %32 : vector<8x128xf32>
    %62 = arith.mulf %61, %19 : vector<8x128xf32>
    %63 = arith.subf %9, %62 : vector<8x128xf32>
    %64 = arith.mulf %40, %32 : vector<8x128xf32>
    %65 = arith.mulf %64, %45 : vector<8x128xf32>
    %66 = arith.addf %63, %65 : vector<8x128xf32>
    %67 = arith.mulf %54, %54 : vector<8x128xf32>
    %68 = arith.mulf %60, %60 : vector<8x128xf32>
    %69 = arith.addf %67, %68 : vector<8x128xf32>
    %70 = arith.mulf %66, %66 : vector<8x128xf32>
    %71 = arith.addf %69, %70 : vector<8x128xf32>
    %72 = math.rsqrt %71 : vector<8x128xf32>
    %73 = arith.mulf %71, %72 : vector<8x128xf32>
    %cst_6 = arith.constant 9.99999974E-6 : f32
    %74 = vector.broadcast %cst_6 : f32 to vector<8x128xf32>
    %75 = arith.addf %73, %74 : vector<8x128xf32>
    %76 = arith.maximumf %48, %75 : vector<8x128xf32>
    %77 = math.sqrt %69 : vector<8x128xf32>
    %78 = arith.mulf %66, %72 : vector<8x128xf32>
    %cst_7 = arith.constant 1.000000e+00 : f32
    %79 = vector.broadcast %cst_7 : f32 to vector<8x128xf32>
    %80 = arith.addf %79, %78 : vector<8x128xf32>
    %cst_8 = arith.constant 1.000000e+00 : f32
    %81 = vector.broadcast %cst_8 : f32 to vector<8x128xf32>
    %82 = arith.subf %81, %78 : vector<8x128xf32>
    %83 = tpu.reciprocal %82 : vector<8x128xf32> -> vector<8x128xf32>
    %84 = arith.mulf %80, %83 : vector<8x128xf32>
    %85 = math.log %84 : vector<8x128xf32>
    %cst_9 = arith.constant 5.000000e-01 : f32
    %86 = vector.broadcast %cst_9 : f32 to vector<8x128xf32>
    %87 = arith.mulf %86, %85 : vector<8x128xf32>
    %88 = math.atan2 %60, %54 : vector<8x128xf32>
    %89 = arith.mulf %76, %76 : vector<8x128xf32>
    %90 = arith.maximumf %89, %71 : vector<8x128xf32>
    %91 = arith.subf %90, %73 : vector<8x128xf32>
    %92 = math.sqrt %91 : vector<8x128xf32>
    %c0_10 = arith.constant 0 : index
    %c0_11 = arith.constant 0 : index
    %93 = vector.load %arg4[%c0_10, %c0_11] : memref<56x128xf32, #tpu.memory_space<vmem>>, vector<8x128xf32>
    tpu.vector_store %arg4[%c0_10, %c0_11], %76 {strides = array<i32>} : memref<56x128xf32, #tpu.memory_space<vmem>>, vector<8x128xf32>,
    %c8 = arith.constant 8 : index
    %c0_12 = arith.constant 0 : index
    %94 = vector.load %arg4[%c8, %c0_12] : memref<56x128xf32, #tpu.memory_space<vmem>>, vector<8x128xf32>
    tpu.vector_store %arg4[%c8, %c0_12], %77 {strides = array<i32>} : memref<56x128xf32, #tpu.memory_space<vmem>>, vector<8x128xf32>,
    %c16 = arith.constant 16 : index
    %c0_13 = arith.constant 0 : index
    %95 = vector.load %arg4[%c16, %c0_13] : memref<56x128xf32, #tpu.memory_space<vmem>>, vector<8x128xf32>
    tpu.vector_store %arg4[%c16, %c0_13], %87 {strides = array<i32>} : memref<56x128xf32, #tpu.memory_space<vmem>>, vector<8x128xf32>,
    %c24 = arith.constant 24 : index
    %c0_14 = arith.constant 0 : index
    %96 = vector.load %arg4[%c24, %c0_14] : memref<56x128xf32, #tpu.memory_space<vmem>>, vector<8x128xf32>
    tpu.vector_store %arg4[%c24, %c0_14], %88 {strides = array<i32>} : memref<56x128xf32, #tpu.memory_space<vmem>>, vector<8x128xf32>,
    %c32 = arith.constant 32 : index
    %c0_15 = arith.constant 0 : index
    %97 = vector.load %arg4[%c32, %c0_15] : memref<56x128xf32, #tpu.memory_space<vmem>>, vector<8x128xf32>
    tpu.vector_store %arg4[%c32, %c0_15], %92 {strides = array<i32>} : memref<56x128xf32, #tpu.memory_space<vmem>>, vector<8x128xf32>,
    %98 = tpu.iota {dimensions = array<i32: 0>} : vector<8x128xi32>
    %c6_i32 = arith.constant 6 : i32
    %99 = vector.broadcast %c6_i32 : i32 to vector<8x128xi32>
    %100 = arith.cmpi slt, %98, %99 : vector<8x128xi32>
    %101 = arith.mulf %54, %72 : vector<8x128xf32>
    %cst_16 = arith.constant 0.000000e+00 : f32
    %102 = vector.broadcast %cst_16 : f32 to vector<8x128xf32>
    %103 = arith.select %100, %101, %102 : vector<8x128xi1>, vector<8x128xf32>
    %104 = arith.mulf %60, %72 : vector<8x128xf32>
    %cst_17 = arith.constant 0.000000e+00 : f32
    %105 = vector.broadcast %cst_17 : f32 to vector<8x128xf32>
    %106 = arith.select %100, %104, %105 : vector<8x128xi1>, vector<8x128xf32>
    %107 = arith.mulf %66, %72 : vector<8x128xf32>
    %cst_18 = arith.constant 0.000000e+00 : f32
    %108 = vector.broadcast %cst_18 : f32 to vector<8x128xf32>
    %109 = arith.select %100, %107, %108 : vector<8x128xi1>, vector<8x128xf32>
    %110 = tpu.concatenate %103, %106, %109 in 0 : vector<8x128xf32>, vector<8x128xf32>, vector<8x128xf32> -> vector<24x128xf32>
    %c0_19 = arith.constant 0 : index
    %c0_20 = arith.constant 0 : index
    %111 = vector.load %arg3[%c0_19, %c0_20] : memref<96x24xf32, #tpu.memory_space<vmem>>, vector<96x24xf32>
    %cst_21 = arith.constant dense<0.000000e+00> : vector<96x128xf32>
    %112 = tpu.matmul %111, %110, %cst_21 {dimension_numbers = #tpu.dot_dimension_numbers<[1], [0], [0], [1], [0, 0, 1, 1], [], []>} : vector<96x24xf32>, vector<24x128xf32>, vector<96x128xf32> -> vector<96x128xf32>
    %113 = vector.extract_strided_slice %112 {offsets = [0, 0], sizes = [16, 128], strides = [1, 1]} : vector<96x128xf32> to vector<16x128xf32>
    %114 = vector.extract_strided_slice %112 {offsets = [48, 0], sizes = [16, 128], strides = [1, 1]} : vector<96x128xf32> to vector<16x128xf32>
    %115 = arith.mulf %113, %114 : vector<16x128xf32>
    %116 = vector.extract_strided_slice %112 {offsets = [16, 0], sizes = [16, 128], strides = [1, 1]} : vector<96x128xf32> to vector<16x128xf32>
    %117 = vector.extract_strided_slice %112 {offsets = [64, 0], sizes = [16, 128], strides = [1, 1]} : vector<96x128xf32> to vector<16x128xf32>
    %118 = arith.mulf %116, %117 : vector<16x128xf32>
    %119 = arith.addf %115, %118 : vector<16x128xf32>
    %120 = vector.extract_strided_slice %112 {offsets = [32, 0], sizes = [16, 128], strides = [1, 1]} : vector<96x128xf32> to vector<16x128xf32>
    %121 = vector.extract_strided_slice %112 {offsets = [80, 0], sizes = [16, 128], strides = [1, 1]} : vector<96x128xf32> to vector<16x128xf32>
    %122 = arith.mulf %120, %121 : vector<16x128xf32>
    %123 = arith.addf %119, %122 : vector<16x128xf32>
    %c40 = arith.constant 40 : index
    %c0_22 = arith.constant 0 : index
    %124 = vector.load %arg4[%c40, %c0_22] : memref<56x128xf32, #tpu.memory_space<vmem>>, vector<16x128xf32>
    tpu.vector_store %arg4[%c40, %c0_22], %123 {strides = array<i32>} : memref<56x128xf32, #tpu.memory_space<vmem>>, vector<16x128xf32>,
    return
  }
  func.func @transform_0(%arg0: i32) -> (i32, i32) {
    %c0_i32 = arith.constant 0 : i32
    %c0_i32_0 = arith.constant 0 : i32
    return %c0_i32, %arg0 : i32, i32
  }
  func.func @transform_1(%arg0: i32) -> (i32, i32) {
    %c0_i32 = arith.constant 0 : i32
    %c0_i32_0 = arith.constant 0 : i32
    %c0_i32_1 = arith.constant 0 : i32
    return %c0_i32, %c0_i32_0 : i32, i32
  }
  func.func @transform_2(%arg0: i32) -> (i32, i32) {
    %c0_i32 = arith.constant 0 : i32
    %c0_i32_0 = arith.constant 0 : i32
    %c0_i32_1 = arith.constant 0 : i32
    return %c0_i32, %c0_i32_0 : i32, i32
  }
  func.func @transform_3(%arg0: i32) -> (i32, i32) {
    %c0_i32 = arith.constant 0 : i32
    %c0_i32_0 = arith.constant 0 : i32
    return %c0_i32, %arg0 : i32, i32
  }
}

</mosaic_0001>

<bundles_post_ra>
// kernel: lbn_forward.1
= control target key start
LH: loop header
LB: loop body
LE: loop exit
PB: predicated region body
PF: predicated region fallthrough
CT: control target
= control target key end

     0   :  { %s1024_s12 = smov 0   ;;  %s1026_s13 = smov 0   ;;  %s1263_s0 = inlined_call_operand.vmem [shape: f32[32,256], index: 0, kind: input, shape index: {}]   ;;  %s1264_s1 = inlined_call_operand.vmem [shape: f32[64,32], index: 1, kind: input, shape index: {}]   ;;  %s1265_s2 = inlined_call_operand.vmem [shape: f32[96,24], index: 2, kind: input, shape index: {}]   ;;  %s1266_s3 = inlined_call_operand.vmem [shape: f32[56,256], index: 3, kind: output, shape index: {}]  }
   0x1   :  { %s1028_s14 = smov 0  }
   0x2 LB: > { %s813_s15 = sadd.s32 4294967295, %s1000_s14   ;;  %s1041_s16 = sadd.s32 1, %s1000_s14   ;;  %s1000_s14 = sphi %s1028_s14, %s1274_s14   ;;  %s996_s13 = sphi %s1026_s13, %s1273_s13   ;;  %s992_s12 = sphi %s1024_s12, %s1272_s12  }
   0x3   : > { %s17_s17 = ssub.s32 %s1000_s14, %s1041_s16  ;;  %s20_s18 = sadd.s32 1, %s996_s13 }
   0x4   : > { %p18_p0 = scmp.eq.s32.totalorder %s17_s17, 0  ;;  %p27_p1 = scmp.ne.s32.totalorder %s996_s13, %s992_s12 }
   0x5   : > { %p28_p2 = scmp.eq.s32.totalorder %s1000_s14, 0  ;;  %p99_p3 = scmp.eq.s32.totalorder %s813_s15, 1 }
   0x6   : > { %s1052_s19 = scalar_select %p18_p0, %s996_s13, %s20_s18  }
   0x7   : > { %p29_p4 = por %p28_p2, %p27_p1  ;;  %p1054_p5 = por %p99_p3, %p27_p1 }
   0x8   : > { %p816_p6 = scmp.ge.s32.totalorder %s1000_s14, 2 }
   0xa   : > { %127 = sbr.rel (%p816_p6) target bundleno = 24 (0x18), region = 24 }
  0x11   : > { %130 = sbr.rel (!%p29_p4) target bundleno = 24 (0x18), region = 28  ;;  %s132_s21 = sand.u32 (%p29_p4), 1, %s996_s13  }
  0x12   : > { %s818_s22 = sshll.u32 (%p29_p4), %s1000_s14, 3  ;;  %s817_s23 = sshll.u32 (%p29_p4), %s132_s21, 5 }
  0x13   : > { %s136_s26 = scalar_lea.vmem (%p29_p4), %s1263_s0, %s818_s22  ;;  %s134_s27 = scalar_lea.vmem (%p29_p4), [#allocation2], %s817_s23 }
  0x14   : > { %v170_v0 = vld [vmem:[%s136_s26] sm:$0xff] (%p29_p4)  ;;  %v172_v1 = vld [vmem:[%s136_s26 + $0x10] sm:$0xff] (%p29_p4) }
  0x15   : > { %v174_v2 = vld [vmem:[%s136_s26 + $0x20] sm:$0xff] (%p29_p4)  ;;  %171 = vst [vmem:[%s134_s27] sm:$0xff] (%p29_p4), %v170_v0  ;;  %173 = vst [vmem:[%s134_s27 + $0x8] sm:$0xff] (%p29_p4), %v172_v1  ;;  %v176_v3 = vld [vmem:[%s136_s26 + $0x30] sm:$0xff] (%p29_p4) }
  0x16   : > { %175 = vst [vmem:[%s134_s27 + $0x10] sm:$0xff] (%p29_p4), %v174_v2  ;;  %177 = vst [vmem:[%s134_s27 + $0x18] sm:$0xff] (%p29_p4), %v176_v3 }
  0x18 PF: > { %p819_p7 = scmp.ge.s32.totalorder %s1000_s14, 1  ;;  %p182_p8 = scmp.lt.s32.totalorder %s1000_s14, 3 }
  0x1a   : > { %p183_p9 = pnand %p819_p7, %p182_p8 }
  0x1b   : > { %s189_s28 = sand.u32 (!%p183_p9), 1, %s992_s12   ;;  %v211_v4 = vld [vmem:[%s1264_s1] sm:$0xff] (!%p183_p9)  ;;  %vm223_vm0 = vcmask (!%p183_p9), 261120   ;;  %v212_v11 = vld [vmem:[%s1264_s1 + $0x8] sm:$0xff] (!%p183_p9)  ;;  %v213_v12 = vld [vmem:[%s1264_s1 + $0x10] sm:$0xff] (!%p183_p9)  ;;  %vm518_vm1 = vcmask (!%p183_p9), 195584  }
  0x1c   : > { %186 = sbr.rel (%p183_p9) target bundleno = 586 (0x24a), region = 66  ;;  %s820_s4 = sshll.u32 (!%p183_p9), %s189_s28, 5  ;;  %883 = vmatprep.mubr.msk.f32.mxu0 (!%p183_p9), %vm223_vm0, %v211_v4  ;;  %v214_v13 = vld [vmem:[%s1264_s1 + $0x18] sm:$0xff] (!%p183_p9)  ;;  %v215_v14 = vld [vmem:[%s1264_s1 + $0x20] sm:$0xff] (!%p183_p9)  ;;  %v216_v15 = vld [vmem:[%s1264_s1 + $0x28] sm:$0xff] (!%p183_p9) }
  0x1d   : > { %s191_s5 = scalar_lea.vmem (!%p183_p9), [#allocation2], %s820_s4  ;;  %v217_v16 = vld [vmem:[%s1264_s1 + $0x30] sm:$0xff] (!%p183_p9)  ;;  %v218_v17 = vld [vmem:[%s1264_s1 + $0x38] sm:$0xff] (!%p183_p9)  ;;  %v506_v18 = vld [vmem:[%s1265_s2] sm:$0xff] (!%p183_p9)  ;;  %s933_s30 = smul.u32 (!%p183_p9), 56, %s189_s28 }
  0x1e   : > { %v219_v5 = vld [vmem:[%s191_s5] sm:$0xff] (!%p183_p9)  ;;  %v220_v6 = vld [vmem:[%s191_s5 + $0x8] sm:$0xff] (!%p183_p9)  ;;  %v221_v7 = vld [vmem:[%s191_s5 + $0x10] sm:$0xff] (!%p183_p9)  ;;  %901 = vmatprep.mubr.msk.f32.mxu1 (!%p183_p9), %vm518_vm1, %v506_v18 }
  0x1f   : > { %v919_v8 = vpack.c.bf16 (!%p183_p9), %v220_v6, %v219_v5  ;;  %v222_v9 = vld [vmem:[%s191_s5 + $0x18] sm:$0xff] (!%p183_p9)  ;;  %s1161_s12 = scalar_lea.vmem (!%p183_p9), [#allocation3], %s933_s30 }
  0x20   : > { %v923_v10 = vpack.c.bf16 (!%p183_p9), %v222_v9, %v221_v7 }
  0x21   : > { %920 = vmatprep.subr.bf16.mxu0 (!%p183_p9), %v919_v8 }
  0x22   : > { %922 = vmatpush3.bf16.msra.mxu0 (!%p183_p9), %v919_v8 }
  0x23   : > { %924 = vmatprep.subr.bf16.mxu0 %v923_v10  ;;  %s845_s5 = sshll.u32 (%p1054_p5), %s813_s15, 3 }
  0x24   : > { %s700_s8 = scalar_lea.vmem (%p1054_p5), %s1266_s3, %s845_s5 }
  0x26   : > { %926 = vmatpush3.bf16.msra.mxu0 %v923_v10 }
  0x29   : > { %884 = vmatmul.mubr.msk.f32.vlgmr.msra.gmra.mrb[0].mxu0 %vm223_vm0, %v212_v11 }
  0x2a   : > { %886 = vmatprep.mubr.msk.f32.mxu0 %vm223_vm0, %v213_v12 }
  0x2d   : > { %887 = vmatmul.mubr.msk.f32.gmra.mrb[2].mxu0 %vm223_vm0, %v214_v13 }
  0x2e   : > { %889 = vmatprep.mubr.msk.f32.mxu0 %vm223_vm0, %v215_v14 }
  0x31   : > { %890 = vmatmul.mubr.msk.f32.gmra.mrb[4].mxu0 %vm223_vm0, %v216_v15 }
  0x32   : > { %892 = vmatprep.mubr.msk.f32.mxu0 %vm223_vm0, %v217_v16 }
  0x35   : > { %893 = vmatmul.mubr.msk.f32.gmra.mrb[6].mxu0 %vm223_vm0, %v218_v17 }
  0xfc   : > { %v885_v19 = vpop.f32.mrb[0].mxu0 }
  0xfd   : > { %v314_v20 = vpop.f32.mrb[1].mxu0 }
 0x100   : > { %v888_v21 = vpop.f32.mrb[2].mxu0 }
 0x101   : > { %v1105_v22 = vpop.f32.mrb[3].mxu0  ;;  %v367_v24 = vmul.f32 %v888_v21, %v888_v21 }
 0x102   : > { %v353_v27 = vmul.f32 %v1105_v22, %v1105_v22 }
 0x104   : > { %v891_v23 = vpop.f32.mrb[4].mxu0 }
 0x105   : > { %v368_v25 = vmul.f32 %v891_v23, %v891_v23  ;;  %v334_v26 = vpop.f32.mrb[5].mxu0 }
 0x106   : > { %v354_v28 = vmul.f32 %v334_v26, %v334_v26 }
 0x107   : > { %v369_v29 = vadd.f32 %v368_v25, %v367_v24 }
 0x108   : > { %v355_v30 = vadd.f32 %v354_v28, %v353_v27  ;;  %v894_v31 = vpop.f32.mrb[6].mxu0 }
 0x109   : > { %v370_v32 = vmul.f32 %v894_v31, %v894_v31  ;;  %v344_v33 = vpop.f32.mrb[7].mxu0 }
 0x10a   : > { %v356_v34 = vmul.f32 %v344_v33, %v344_v33 }
 0x10b   : > { %v371_v35 = vadd.f32 %v370_v32, %v369_v29 }
 0x10c   : > { %v357_v36 = vadd.f32 %v356_v34, %v355_v30 }
 0x10d   : > { %960 = vrsqrt.f32 %v371_v35 }
 0x10e   : > { %962 = vrsqrt.f32 %v357_v36  ;;  %vm360_vm2 = vcmp.eq.f32.partialorder %v357_v36, inf  ;;  %v363_v44 = vand.u32 2147483648, %v357_v36  ;;  %vm362_vm3 = vcmp.eq.f32.partialorder %v357_v36, 0.0 }
 0x117   : > { %v961_v37 = vpop.eup %960 }
 0x118   : > { %v963_v38 = vpop.eup %962  ;;  %v373_v39 = vmul.f32 %v961_v37, %v371_v35  ;;  %v378_v40 = vmul.f32 %v961_v37, %v894_v31  ;;  %v376_v41 = vmul.f32 %v961_v37, %v888_v21  ;;  %v377_v42 = vmul.f32 %v961_v37, %v891_v23 }
 0x119   : > { %v359_v43 = vmul.f32 %v963_v38, %v357_v36  ;;  %v498_v31 = vlaneseq }
 0x11a   : > { %v374_v45 = vadd.f32 1e-05, %v373_v39  ;;  %v386_v46 = vmul.f32 %v376_v41, %v1105_v22  ;;  %v387_v47 = vmul.f32 %v377_v42, %v334_v26  ;;  %v389_v48 = vmul.f32 %v378_v40, %v344_v33 }
 0x11b   : > { %v361_v49 = vsel %vm360_vm2, %v357_v36, %v359_v43  ;;  %v499_v32 = vshrl.u32 %v498_v31, 7 }
 0x11c   : > { %v375_v50 = vmax.f32 %v885_v19, %v374_v45  ;;  %v364_v51 = vsel %vm362_vm3, %v363_v44, %v361_v49  ;;  %v388_v52 = vadd.f32 %v387_v47, %v386_v46 }
 0x11d   : > { %v365_v53 = vadd.f32 1e-05, %v364_v51  ;;  %vm500_vm11 = vcmp.lt.s32.totalorder %v499_v32, 6 }
 0x11e   : > { %v379_v54 = vsub.f32 %v375_v50, %v373_v39  ;;  %v380_v55 = vadd.f32 %v375_v50, %v373_v39  ;;  %v390_v56 = vadd.f32 %v389_v48, %v388_v52  ;;  %vm928_vm14 = vmpackc.low %vm500_vm11, %vm500_vm11 }
 0x11f   : > { %v366_v57 = vmax.f32 %v314_v20, %v365_v53 }
 0x120   : > { %v381_v58 = vmul.f32 %v380_v55, %v379_v54  ;;  %v507_v55 = vld [vmem:[%s1265_s2 + $0x8] sm:$0xff] }
 0x122   : > { %964 = vrsqrt.f32 %v381_v58 }
 0x12c   : > { %v965_v59 = vpop.eup %964 }
 0x12d   : > { %v383_v60 = vmul.f32 %v965_v59, %v375_v50  ;;  %v384_v61 = vmul.f32 %v965_v59, %v373_v39 }
 0x12f   : > { %v829_v62 = vadd.f32 -1.0, %v383_v60  ;;  %v1110_v63 = vmul.f32 %v383_v60, %v366_v57  ;;  %v1112_v0 = vmul.f32 %v390_v56, %v384_v61  ;;  %v394_v1 = vmul.f32 %v384_v61, %v376_v41  ;;  %v509_v60 = vld [vmem:[%s1265_s2 + $0x18] sm:$0xff] }
 0x130   : > { %v400_v2 = vmul.f32 %v384_v61, %v377_v42  ;;  %v406_v3 = vmul.f32 %v384_v61, %v378_v40 }
 0x131   : > { %v409_v4 = vmul.f32 %v829_v62, %v378_v40  ;;  %v393_v5 = vsub.f32 %v1110_v63, %v1112_v0  ;;  %v395_v6 = vmul.f32 %v394_v1, %v366_v57  ;;  %v397_v7 = vmul.f32 %v829_v62, %v376_v41  ;;  %v510_v63 = vld [vmem:[%s1265_s2 + $0x20] sm:$0xff] }
 0x132   : > { %v401_v8 = vmul.f32 %v400_v2, %v366_v57  ;;  %v403_v9 = vmul.f32 %v829_v62, %v377_v42  ;;  %v407_v10 = vmul.f32 %v406_v3, %v366_v57  ;;  %v508_v57 = vld [vmem:[%s1265_s2 + $0x10] sm:$0xff]  ;;  %v511_v3 = vld [vmem:[%s1265_s2 + $0x28] sm:$0xff] }
 0x133   : > { %v396_v11 = vsub.f32 %v1105_v22, %v395_v6  ;;  %v398_v12 = vmul.f32 %v397_v7, %v390_v56  ;;  %v410_v13 = vmul.f32 %v409_v4, %v390_v56  ;;  %v513_v7 = vld [vmem:[%s1265_s2 + $0x38] sm:$0xff] }
 0x134   : > { %v402_v14 = vsub.f32 %v334_v26, %v401_v8  ;;  %v404_v15 = vmul.f32 %v403_v9, %v390_v56  ;;  %v408_v16 = vsub.f32 %v344_v33, %v407_v10  ;;  %v514_v9 = vld [vmem:[%s1265_s2 + $0x40] sm:$0xff] }
 0x135   : > { %v1117_v17 = vadd.f32 %v398_v12, %v396_v11 }
 0x136   : > { %v1119_v18 = vadd.f32 %v404_v15, %v402_v14  ;;  %v411_v19 = vadd.f32 %v410_v13, %v408_v16  ;;  %v515_v14 = vld [vmem:[%s1265_s2 + $0x48] sm:$0xff] }
 0x137   : > { %v412_v20 = vmul.f32 %v1117_v17, %v1117_v17  ;;  %v1124_v21 = vand.u32 2147483647, %v1117_v17  ;;  %vm470_vm4 = vcmp.ne.f32.partialorder %v1117_v17, %v1117_v17  ;;  %vm466_vm2 = vcmp.lt.s32.totalorder %v1117_v17, 0 }
 0x138   : > { %v413_v23 = vmul.f32 %v1119_v18, %v1119_v18  ;;  %v1129_v22 = vand.u32 2147483647, %v1119_v18  ;;  %v415_v24 = vmul.f32 %v411_v19, %v411_v19  ;;  %vm471_vm5 = vcmp.ne.f32.partialorder %v1119_v18, %v1119_v18 }
 0x139   : > { %vm1141_vm7 = vmor %vm470_vm4, %vm471_vm5  ;;  %vm476_vm8 = vcmp.eq.s32.totalorder %v1124_v21, inf  ;;  %vm463_vm3 = vcmp.lt.f32.partialorder %v1117_v17, 0.0 }
 0x13a   : > { %v414_v25 = vadd.f32 %v413_v23, %v412_v20  ;;  %v438_v26 = vmin.f32 %v1124_v21, %v1129_v22  ;;  %v439_v27 = vmax.f32 %v1124_v21, %v1129_v22  ;;  %vm460_vm6 = vcmp.gt.f32.partialorder %v1129_v22, %v1124_v21 }
 0x13b   : > { %vm477_vm9 = vcmp.eq.s32.totalorder %v1129_v22, inf }
 0x13c   : > { %v416_v29 = vadd.f32 %v415_v24, %v414_v25  ;;  %966 = vrsqrt.f32 %v414_v25  ;;  %vm1147_vm10 = vmand %vm476_vm8, %vm477_vm9  ;;  %vm423_vm12 = vcmp.eq.f32.partialorder %v414_v25, inf  ;;  %vm425_vm13 = vcmp.eq.f32.partialorder %v414_v25, 0.0 }
 0x13d   : > { %968 = vrcp.f32 %v439_v27  ;;  %v426_v37 = vand.u32 2147483648, %v414_v25 }
 0x13e   : > { %970 = vrsqrt.f32 %v416_v29 }
 0x146   : > { %v967_v33 = vpop.eup %966 }
 0x147   : > { %v969_v34 = vpop.eup %968  ;;  %v422_v35 = vmul.f32 %v967_v33, %v414_v25 }
 0x148   : > { %v971_v36 = vpop.eup %970  ;;  %v1153_v38 = vmul.f32 %v969_v34, %v438_v26  ;;  %v517_v26 = vld [vmem:[%s1265_s2 + $0x58] sm:$0xff] }
 0x149   : > { %v418_v39 = vmul.f32 %v971_v36, %v416_v29  ;;  %v424_v40 = vsel %vm423_vm12, %v414_v25, %v422_v35  ;;  %v428_v41 = vmul.f32 %v971_v36, %v411_v19  ;;  %v501_v42 = vmul.f32 %v971_v36, %v1117_v17  ;;  %v516_v19 = vld [vmem:[%s1265_s2 + $0x50] sm:$0xff] }
 0x14a   : > { %v427_v43 = vsel %vm425_vm13, %v426_v37, %v424_v40  ;;  %v1158_v44 = vmul.f32 %v1153_v38, %v1153_v38  ;;  %v503_v45 = vmul.f32 %v971_v36, %v1119_v18 }
 0x14b   : > { %v419_v46 = vadd.f32 1e-05, %v418_v39  ;;  %v430_v47 = vsub.f32 1.0, %v428_v41  ;;  %494 = vst [vmem:[%s1161_s12 + $0x8] sm:$0xff] %v427_v43  ;;  %v429_v61 = vadd.f32 1.0, %v428_v41 }
 0x14c   : > { %v443_v48 = vmul.f32 0.002785687, %v1158_v44  ;;  %v927_v49 = vpack.c.bf16 %v503_v45, %v501_v42  ;;  %v1003_v42 = vmov 0.7853982  }
 0x14d   : > { %v420_v50 = vmax.f32 %v393_v5, %v419_v46  ;;  %972 = vrcp.f32 %v430_v47  ;;  %v512_v5 = vld [vmem:[%s1265_s2 + $0x30] sm:$0xff]  ;;  %v475_v43 = vsel %vm463_vm3, 2.3561945, %v1003_v42 }
 0x14e   : > { %v444_v51 = vadd.f32 -0.015866, %v443_v48  ;;  %929 = vmatprep.subr.msk.bf16.mxu1 %vm928_vm14, %v927_v49 }
 0x14f   : > { %v483_v52 = vmul.f32 %v420_v50, %v420_v50  ;;  %493 = vst [vmem:[%s1161_s12] sm:$0xff] %v420_v50  ;;  %932 = vmatpush3.bf16.msk.msra.mxu1 %vm928_vm14, %v927_v49 }
 0x150   : > { %v445_v53 = vmul.f32 %v444_v51, %v1158_v44  ;;  %899 = vmatprep.subr.msk.mxu1 %vm500_vm11, %v428_v41 }
 0x151   : > { %v484_v54 = vmax.f32 %v483_v52, %v416_v29 }
 0x152   : > { %v446_v56 = vadd.f32 0.04247222, %v445_v53 }
 0x153   : > { %v485_v58 = vsub.f32 %v484_v54, %v418_v39  ;;  %900 = vmatpush3.msk.msra.mxu1 %vm500_vm11, %v428_v41  ;;  %v1002_v39 = vmov 0.0  }
 0x154   : > { %v447_v59 = vmul.f32 %v446_v56, %v1158_v44  ;;  %902 = vmatmul.mubr.msk.f32.vlgmr.msra.gmra.mrb[0].mxu1 %vm518_vm1, %v507_v55  ;;  %v467_v40 = vsel %vm466_vm2, 3.1415927, %v1002_v39 }
 0x155   : > { %974 = vrsqrt.f32 %v485_v58  ;;  %904 = vmatprep.mubr.msk.f32.mxu1 %vm518_vm1, %v508_v57  ;;  %vm488_vm15 = vcmp.eq.f32.partialorder %v485_v58, inf  ;;  %v491_v13 = vand.u32 2147483648, %v485_v58  ;;  %vm490_vm0 = vcmp.eq.f32.partialorder %v485_v58, 0.0 }
 0x156   : > { %v448_v62 = vadd.f32 -0.074975304, %v447_v59 }
 0x157   : > { %v973_v0 = vpop.eup %972 }
 0x158   : > { %v432_v1 = vmul.f32 %v973_v0, %v429_v61  ;;  %v449_v2 = vmul.f32 %v448_v62, %v1158_v44  ;;  %905 = vmatmul.mubr.msk.f32.gmra.mrb[2].mxu1 %vm518_vm1, %v509_v60  ;;  %v740_v0 = vld [vmem:[%s1161_s12] sm:$0xff] (%p1054_p5) }
 0x159   : > { %907 = vmatprep.mubr.msk.f32.mxu1 %vm518_vm1, %v510_v63  ;;  %741 = vst [vmem:[%s700_s8] sm:$0xff] (%p1054_p5), %v740_v0 }
 0x15a   : > { %976 = vlog2.f32 %v432_v1  ;;  %v450_v4 = vadd.f32 0.1064488, %v449_v2  ;;  %v742_v1 = vld [vmem:[%s1161_s12 + $0x8] sm:$0xff] (%p1054_p5) }
 0x15b   : > { %743 = vst [vmem:[%s700_s8 + $0x10] sm:$0xff] (%p1054_p5), %v742_v1 }
 0x15c   : > { %v451_v6 = vmul.f32 %v450_v4, %v1158_v44  ;;  %908 = vmatmul.mubr.msk.f32.gmra.mrb[4].mxu1 %vm518_vm1, %v511_v3 }
 0x15d   : > { %910 = vmatprep.mubr.msk.f32.mxu1 %vm518_vm1, %v512_v5 }
 0x15e   : > { %v452_v8 = vadd.f32 -0.14207031, %v451_v6 }
 0x15f   : > { %v975_v10 = vpop.eup %974 }
 0x160   : > { %v453_v11 = vmul.f32 %v452_v8, %v1158_v44  ;;  %v487_v12 = vmul.f32 %v975_v10, %v485_v58  ;;  %911 = vmatmul.mubr.msk.f32.gmra.mrb[6].mxu1 %vm518_vm1, %v513_v7 }
 0x161   : > { %913 = vmatprep.mubr.msk.f32.mxu1 %vm518_vm1, %v514_v9 }
 0x162   : > { %v454_v15 = vadd.f32 0.19993454, %v453_v11  ;;  %v489_v16 = vsel %vm488_vm15, %v485_v58, %v487_v12 }
 0x163   : > { %v492_v20 = vsel %vm490_vm0, %v491_v13, %v489_v16 }
 0x164   : > { %v977_v23 = vpop.eup %976  ;;  %v455_v24 = vmul.f32 %v454_v15, %v1158_v44  ;;  %497 = vst [vmem:[%s1161_s12 + $0x20] sm:$0xff] %v492_v20  ;;  %914 = vmatmul.mubr.msk.f32.gmra.mrb[8].mxu1 %vm518_vm1, %v515_v14 }
 0x165   : > { %v434_v25 = vmul.f32 0.6931472, %v977_v23  ;;  %916 = vmatprep.mubr.msk.f32.mxu1 %vm518_vm1, %v516_v19 }
 0x166   : > { %v456_v27 = vadd.f32 -0.33333147, %v455_v24 }
 0x167   : > { %v435_v29 = vmul.f32 0.5, %v434_v25 }
 0x168   : > { %v457_v31 = vmul.f32 %v456_v27, %v1158_v44  ;;  %917 = vmatmul.mubr.msk.f32.gmra.mrb[10].mxu1 %vm518_vm1, %v517_v26  ;;  %vm468_vm1 = vcmp.eq.f32.partialorder %v1119_v18, 0.0  ;;  %v481_v44 = vand.u32 2147483648, %v1119_v18 }
 0x169   : > { %495 = vst [vmem:[%s1161_s12 + $0x10] sm:$0xff] %v435_v29 }
 0x16a   : > { %v458_v32 = vmul.f32 %v457_v31, %v1153_v38 }
 0x16b   : > { %v748_v4 = vld [vmem:[%s1161_s12 + $0x20] sm:$0xff] (%p1054_p5) }
 0x16c   : > { %v459_v33 = vadd.f32 %v458_v32, %v1153_v38  ;;  %749 = vst [vmem:[%s700_s8 + $0x40] sm:$0xff] (%p1054_p5), %v748_v4 }
 0x16e   : > { %v461_v34 = vsub.f32 1.5707964, %v459_v33 }
 0x170   : > { %v462_v35 = vsel %vm460_vm6, %v461_v34, %v459_v33  ;;  %v744_v2 = vld [vmem:[%s1161_s12 + $0x10] sm:$0xff] (%p1054_p5) }
 0x171   : > { %v464_v36 = vsub.f32 3.1415927, %v462_v35  ;;  %745 = vst [vmem:[%s700_s8 + $0x20] sm:$0xff] (%p1054_p5), %v744_v2 }
 0x173   : > { %v465_v37 = vsel %vm463_vm3, %v464_v36, %v462_v35 }
 0x174   : > { %v469_v41 = vsel %vm468_vm1, %v467_v40, %v465_v37 }
 0x175   : > { %v473_v38 = vsel %vm1141_vm7, nan, %v469_v41 }
 0x176   : > { %v479_v21 = vsel %vm1147_vm10, %v475_v43, %v473_v38 }
 0x177   : > { %v480_v22 = vand.u32 2147483647, %v479_v21 }
 0x179   : > { %v482_v45 = vor.u32 %v481_v44, %v480_v22 }
 0x17b   : > { %496 = vst [vmem:[%s1161_s12 + $0x18] sm:$0xff] %v482_v45 }
 0x182   : > { %v746_v3 = vld [vmem:[%s1161_s12 + $0x18] sm:$0xff] (%p1054_p5) }
 0x183   : > { %747 = vst [vmem:[%s700_s8 + $0x30] sm:$0xff] (%p1054_p5), %v746_v3 }
 0x227   : > { %v903_v17 = vpop.f32.mrb[0].mxu1 }
 0x228   : > { %v621_v46 = vpop.f32.mrb[1].mxu1 }
 0x22b   : > { %v906_v47 = vpop.f32.mrb[2].mxu1 }
 0x22c   : > { %v631_v48 = vpop.f32.mrb[3].mxu1 }
 0x22f   : > { %v909_v49 = vpop.f32.mrb[4].mxu1 }
 0x230   : > { %v641_v50 = vpop.f32.mrb[5].mxu1 }
 0x233   : > { %v912_v51 = vpop.f32.mrb[6].mxu1 }
 0x234   : > { %v681_v28 = vmul.f32 %v912_v51, %v903_v17  ;;  %v651_v52 = vpop.f32.mrb[7].mxu1 }
 0x235   : > { %v680_v53 = vmul.f32 %v651_v52, %v621_v46 }
 0x237   : > { %v915_v54 = vpop.f32.mrb[8].mxu1 }
 0x238   : > { %v683_v30 = vmul.f32 %v915_v54, %v906_v47  ;;  %v661_v55 = vpop.f32.mrb[9].mxu1 }
 0x239   : > { %v682_v56 = vmul.f32 %v661_v55, %v631_v48 }
 0x23a   : > { %v685_v57 = vadd.f32 %v683_v30, %v681_v28 }
 0x23b   : > { %v684_v18 = vadd.f32 %v682_v56, %v680_v53  ;;  %v918_v58 = vpop.f32.mrb[10].mxu1  ;;  %698 = sbr.rel (!%p1054_p5) target bundleno = 586 (0x24a), region = 74 }
 0x23c   : > { %v687_v59 = vmul.f32 %v918_v58, %v909_v49  ;;  %v671_v60 = vpop.f32.mrb[11].mxu1 }
 0x23d   : > { %v686_v61 = vmul.f32 %v671_v60, %v641_v50 }
 0x23e   : > { %v689_v62 = vadd.f32 %v687_v59, %v685_v57 }
 0x23f   : > { %v688_v63 = vadd.f32 %v686_v61, %v684_v18 }
 0x240   : > { %691 = vst [vmem:[%s1161_s12 + $0x30] sm:$0xff] %v689_v62 }
 0x241   : > { %690 = vst [vmem:[%s1161_s12 + $0x28] sm:$0xff] %v688_v63 }
 0x247   : > { %v752_v6 = vld [vmem:[%s1161_s12 + $0x30] sm:$0xff] }
 0x248   : > { %v750_v5 = vld [vmem:[%s1161_s12 + $0x28] sm:$0xff]  ;;  %753 = vst [vmem:[%s700_s8 + $0x60] sm:$0xff] %v752_v6 }
 0x249   : > { %751 = vst [vmem:[%s700_s8 + $0x50] sm:$0xff] %v750_v5 }
 0x24a PF: > { %p10_p10 = scmp.ge.s32.totalorder %s1041_s16, 4   ;;  %s1272_s12 = smov %s996_s13 }
 0x24b   : > { %s1273_s13 = smov %s1052_s19  ;;  %s1274_s14 = smov %s1041_s16 }
 0x24c   :  { %12 = sbr.rel (!%p10_p10) target bundleno = 2 (0x2), region = 143 }

</bundles_post_ra>
